<compile_context>
chip_gen: v7x
topology: tpu7x:2x2x1
jax: 0.10.0
libtpu: 0.0.40
codegen_flags: <defaults>
</compile_context>

<pallas_src>
import functools

import numpy as np
import jax
import jax.numpy as jnp
from jax import lax
from jax.experimental import pallas as pl
from jax.experimental.pallas import tpu as pltpu


def _vmem_limit_bytes():
    # Per-generation scoped-VMEM budget: ~3/4 of physical capacity (128 MiB on v5e/v6e,
    # 64 MiB on v7x), conservative fallback if the query is unavailable.
    try:
        cap = pltpu.get_tpu_info().vmem_capacity_bytes
        return min(int(cap * 3 // 4), 100 * 1024 * 1024)
    except Exception:
        return 48 * 1024 * 1024


_VMEM_LIMIT = _vmem_limit_bytes()


# ----------------------------------------------------------------------------
# helpers
# ----------------------------------------------------------------------------
def _round_up(x, m):
    return (x + m - 1) // m * m


def _cdiv(a, b):
    return -(-a // b)


def _pick_tile(d, cands):
    """Largest candidate tile that divides d exactly, else the full dimension."""
    for c in cands:
        if d % c == 0:
            return c
    return d


# ----------------------------------------------------------------------------
# Pallas kernel 1: fused tiled matmul + BN scale/bias + optional residual + ReLU
# ----------------------------------------------------------------------------
def _make_mm_kernel(relu, has_res):
    def kernel(*refs):
        if has_res:
            x_ref, w_ref, s_ref, b_ref, r_ref, o_ref, acc_ref = refs
        else:
            x_ref, w_ref, s_ref, b_ref, o_ref, acc_ref = refs
            r_ref = None
        k = pl.program_id(2)
        part = jnp.dot(x_ref[...], w_ref[...], preferred_element_type=jnp.float32)

        @pl.when(k == 0)
        def _():
            acc_ref[...] = part              # direct write, no zero-init pass

        @pl.when(k > 0)
        def _():
            acc_ref[...] += part

        @pl.when(k == pl.num_programs(2) - 1)
        def _():
            y = acc_ref[...] * s_ref[...] + b_ref[...]
            if has_res:
                y = y + r_ref[...].astype(jnp.float32)
            if relu:
                y = jnp.maximum(y, 0.0)
            o_ref[...] = y.astype(o_ref.dtype)

    return kernel


@functools.lru_cache(maxsize=None)
def _mm_fn(Mp, Kp, Np, tm, tk, tn, relu, has_res):
    kernel = _make_mm_kernel(relu, has_res)
    x_spec = pl.BlockSpec((tm, tk), lambda i, j, k: (i, k))
    w_spec = pl.BlockSpec((tk, tn), lambda i, j, k: (k, j))
    v_spec = pl.BlockSpec((1, tn), lambda i, j, k: (0, j))
    in_specs = [x_spec, w_spec, v_spec, v_spec]
    if has_res:
        in_specs.append(pl.BlockSpec((tm, tn), lambda i, j, k: (i, j)))
    grid_spec = pltpu.PrefetchScalarGridSpec(
        num_scalar_prefetch=0,
        grid=(pl.cdiv(Mp, tm), Np // tn, Kp // tk),
        in_specs=in_specs,
        out_specs=pl.BlockSpec((tm, tn), lambda i, j, k: (i, j)),
        scratch_shapes=[pltpu.VMEM((tm, tn), jnp.float32)],
    )
    f = pl.pallas_call(
        kernel,
        out_shape=jax.ShapeDtypeStruct((Mp, Np), jnp.bfloat16),
        grid_spec=grid_spec,
        compiler_params=pltpu.CompilerParams(
            dimension_semantics=("parallel", "parallel", "arbitrary"),
            vmem_limit_bytes=_VMEM_LIMIT),
    )
    return jax.jit(f)


def matmul_scale_bias_act(xm, wm, s, b, n_valid, relu, residual=None):
    """xm:(M,K) @ wm:(Kp,Np) (weights pre-padded/bf16); epilogue *s +b [+res] [ReLU]."""
    M, K = xm.shape
    Kp, Np = wm.shape
    x = xm.astype(jnp.bfloat16)
    if K != Kp:                                   # only tiny K (27, 64) ever hit this
        x = jnp.pad(x, ((0, 0), (0, Kp - K)))
    res = None
    if residual is not None:
        res = residual.astype(jnp.bfloat16)
        if Np != n_valid:
            res = jnp.pad(res, ((0, 0), (0, Np - n_valid)))
    Mp = _round_up(max(M, 8), 8)
    if Mp != M:                                   # only tiny pooled-feature M hits this
        x = jnp.pad(x, ((0, Mp - M), (0, 0)))
        if res is not None:
            res = jnp.pad(res, ((0, Mp - M), (0, 0)))
    # Bigger tiles at large M (amortise per-step cost), >=2 M-blocks kept at moderate M
    # so the parallel extent stays >=2 on 2-TC parts.
    tm = 512 if Mp >= 1024 else min(256, Mp)
    tk = _pick_tile(Kp, (512, 256, 128))          # multiples of 256/512 preferred
    tn = _pick_tile(Np, (512, 256, 128))
    fn = _mm_fn(Mp, Kp, Np, tm, tk, tn, bool(relu), res is not None)
    out = fn(x, wm, s, b) if res is None else fn(x, wm, s, b, res)
    if Mp != M:
        out = out[:M]
    if Np != n_valid:
        out = out[:, :n_valid]
    return out


# ----------------------------------------------------------------------------
# Pallas kernel 2: direct (im2col-free) stride-1 3x3 conv, dilated, fused BN+ReLU
#   - only H valid output rows are computed (padded-border rows skipped)
#   - padded width aligned to 8 sublanes so tap slices stay (mostly) aligned
#   - 9-tap partial sum kept in <=16 vregs per 128-row sub-tile; cross-Cin
#     accumulation goes through a VMEM f32 scratch (no giant register partials)
# ----------------------------------------------------------------------------
def _make_conv3_kernel(offs, L_pad, tl, relu, n_ci):
    n_sub = L_pad // tl

    def kernel(x_ref, w_ref, s_ref, b_ref, o_ref, *scratch):
        acc_ref = scratch[0] if scratch else None
        ci = pl.program_id(2)
        scale = s_ref[...]
        bias = b_ref[...]
        for si in range(n_sub):
            s0 = si * tl
            part = None
            for t, off in enumerate(offs):
                win = x_ref[0, off + s0: off + s0 + tl, :]   # (tl, tci) shifted window
                r = jnp.dot(win, w_ref[t], preferred_element_type=jnp.float32)
                part = r if part is None else part + r
            if n_ci == 1:
                y = part * scale + bias
                if relu:
                    y = jnp.maximum(y, 0.0)
                o_ref[0, s0:s0 + tl, :] = y.astype(o_ref.dtype)
            else:
                @pl.when(ci == 0)
                def _(part=part, s0=s0):
                    acc_ref[s0:s0 + tl, :] = part

                @pl.when(jnp.logical_and(ci > 0, ci < n_ci - 1))
                def _(part=part, s0=s0):
                    acc_ref[s0:s0 + tl, :] += part

                @pl.when(ci == n_ci - 1)
                def _(part=part, s0=s0):
                    y = (acc_ref[s0:s0 + tl, :] + part) * scale + bias
                    if relu:
                        y = jnp.maximum(y, 0.0)
                    o_ref[0, s0:s0 + tl, :] = y.astype(o_ref.dtype)

    return kernel


@functools.lru_cache(maxsize=None)
def _conv3_fn(N, L_ext, L_pad, Cin, Cout, tci, tco, tl, offs, relu):
    n_ci = Cin // tci
    kernel = _make_conv3_kernel(offs, L_pad, tl, relu, n_ci)
    scratch = [pltpu.VMEM((L_pad, tco), jnp.float32)] if n_ci > 1 else []
    grid_spec = pltpu.PrefetchScalarGridSpec(
        num_scalar_prefetch=0,
        grid=(N, Cout // tco, n_ci),
        in_specs=[
            pl.BlockSpec((1, L_ext, tci), lambda n, co, ci: (n, 0, ci)),
            pl.BlockSpec((9, tci, tco), lambda n, co, ci: (0, ci, co)),
            pl.BlockSpec((1, tco), lambda n, co, ci: (0, co)),
            pl.BlockSpec((1, tco), lambda n, co, ci: (0, co)),
        ],
        out_specs=pl.BlockSpec((1, L_pad, tco), lambda n, co, ci: (n, 0, co)),
        scratch_shapes=scratch,
    )
    f = pl.pallas_call(
        kernel,
        out_shape=jax.ShapeDtypeStruct((N, L_pad, Cout), jnp.bfloat16),
        grid_spec=grid_spec,
        compiler_params=pltpu.CompilerParams(
            dimension_semantics=("parallel", "parallel", "arbitrary"),
            vmem_limit_bytes=_VMEM_LIMIT),
    )
    return jax.jit(f)


def conv3x3_direct(x, p, dilation, relu):
    """Stride-1 3x3 conv (padding == dilation) without materialising im2col."""
    # TODO(synk): at very large images the (whole-L) input/output blocks should be
    # spatially tiled with a 2d-row halo via manual DMA (memory_space=pl.ANY); the
    # current whole-image block is fine for the shapes exercised here.
    x = x.astype(jnp.bfloat16)
    N, H, W, Cin = x.shape
    Cout = p['cout']
    d = dilation
    Wa = _round_up(W + 2 * d, 8)            # sublane-aligned padded width
    L = H * Wa                              # only valid output rows (no border rows)
    tl = min(128, L)                        # sub-tile: (tl, tco) f32 partial <= 16 vregs
    L_pad = _round_up(L, tl)
    max_off = 2 * d * Wa + 2 * d
    rows_needed = _cdiv(L_pad + max_off, Wa)
    bot_pad = rows_needed - (d + H)
    xe = jnp.pad(x, ((0, 0), (d, bot_pad), (d, Wa - W - d), (0, 0))).reshape(
        N, rows_needed * Wa, Cin)
    L_ext = rows_needed * Wa
    tci = _pick_tile(Cin, (512, 256, 128))
    tco = 128 if Cout % 128 == 0 else Cout  # keep the f32 epilogue footprint small (v5e)
    offs = tuple(dy * d * Wa + dx * d for dy in range(3) for dx in range(3))
    out = _conv3_fn(N, L_ext, L_pad, Cin, Cout, tci, tco, tl, offs, bool(relu))(
        xe, p['w9'], p['s'], p['b'])
    return out[:, :L, :].reshape(N, H, Wa, Cout)[:, :, :W, :]


# ----------------------------------------------------------------------------
# Pallas kernel 3a: fused add cascade  (c3=c4+c3 ; c2=c3+c2 ; c1=c2+c1) in one pass
# ----------------------------------------------------------------------------
def _cascade_kernel(a4_ref, a3_ref, a2_ref, a1_ref, o3_ref, o2_ref, o1_ref):
    s3 = a4_ref[...] + a3_ref[...]          # bf16 adds (v5e upcasts internally)
    o3_ref[...] = s3
    s2 = s3 + a2_ref[...]
    o2_ref[...] = s2
    o1_ref[...] = s2 + a1_ref[...]


@functools.lru_cache(maxsize=None)
def _cascade_fn(Mp, C, tm):
    grid_spec = pltpu.PrefetchScalarGridSpec(
        num_scalar_prefetch=0,
        grid=(pl.cdiv(Mp, tm),),
        in_specs=[pl.BlockSpec((tm, C), lambda i: (i, 0))] * 4,
        out_specs=[pl.BlockSpec((tm, C), lambda i: (i, 0))] * 3,
    )
    f = pl.pallas_call(
        _cascade_kernel,
        out_shape=tuple(jax.ShapeDtypeStruct((Mp, C), jnp.bfloat16) for _ in range(3)),
        grid_spec=grid_spec,
        compiler_params=pltpu.CompilerParams(
            dimension_semantics=("parallel",), vmem_limit_bytes=_VMEM_LIMIT),
    )
    return jax.jit(f)


def fused_add_cascade(c4, c3, c2, c1):
    N, H, W, C = c4.shape
    M = N * H * W
    a4, a3, a2, a1 = (t.reshape(M, C).astype(jnp.bfloat16) for t in (c4, c3, c2, c1))
    Mp = _round_up(max(M, 8), 8)
    if Mp != M:
        pad = ((0, Mp - M), (0, 0))
        a4, a3, a2, a1 = (jnp.pad(t, pad) for t in (a4, a3, a2, a1))
    tm = min(2048, Mp)
    o3, o2, o1 = _cascade_fn(Mp, C, tm)(a4, a3, a2, a1)

    def unflat(t):
        if Mp != M:
            t = t[:M]
        return t.reshape(N, H, W, C)

    return unflat(o3), unflat(o2), unflat(o1)


# ----------------------------------------------------------------------------
# Pallas kernel 3b: AFEM attention (softmax over W, mean over C, fused adds)
# ----------------------------------------------------------------------------
def _attn_kernel(a_ref, h_ref, l_ref, ho_ref, lo_ref):
    # softmax over W (axis 1 of the (rows=N*H, W, C) reshape == dim=-1 of NCHW),
    # then mean over channels, att = h * mean ; h_out = h + att ; l_out = l + att.
    a = a_ref[...].astype(jnp.float32)
    m = jnp.max(a, axis=1, keepdims=True)
    e = jnp.exp(a - m)
    p = e / jnp.sum(e, axis=1, keepdims=True)
    att = jnp.mean(p, axis=2, keepdims=True)
    h = h_ref[...].astype(jnp.float32)
    l = l_ref[...].astype(jnp.float32)
    ha = h * att
    ho_ref[...] = (h + ha).astype(ho_ref.dtype)
    lo_ref[...] = (l + ha).astype(lo_ref.dtype)


@functools.lru_cache(maxsize=None)
def _attn_fn(Rp, W, C, tr):
    grid_spec = pltpu.PrefetchScalarGridSpec(
        num_scalar_prefetch=0,
        grid=(pl.cdiv(Rp, tr),),
        in_specs=[pl.BlockSpec((tr, W, C), lambda r: (r, 0, 0))] * 3,
        out_specs=[pl.BlockSpec((tr, W, C), lambda r: (r, 0, 0))] * 2,
    )
    f = pl.pallas_call(
        _attn_kernel,
        out_shape=(jax.ShapeDtypeStruct((Rp, W, C), jnp.bfloat16),
                   jax.ShapeDtypeStruct((Rp, W, C), jnp.bfloat16)),
        grid_spec=grid_spec,
        compiler_params=pltpu.CompilerParams(
            dimension_semantics=("parallel",), vmem_limit_bytes=_VMEM_LIMIT),
    )
    return jax.jit(f)


def attention_combine(a, h, l):
    N, H, W, C = a.shape
    R = N * H
    a2 = a.reshape(R, W, C).astype(jnp.bfloat16)
    h2 = h.reshape(R, W, C).astype(jnp.bfloat16)
    l2 = l.reshape(R, W, C).astype(jnp.bfloat16)
    Rp = _round_up(max(R, 8), 8)
    if Rp != R:
        pad = ((0, Rp - R), (0, 0), (0, 0))
        a2, h2, l2 = (jnp.pad(t, pad) for t in (a2, h2, l2))
    tr = min(256, Rp)
    ho, lo = _attn_fn(Rp, W, C, tr)(a2, h2, l2)
    if Rp != R:
        ho, lo = ho[:R], lo[:R]
    return ho.reshape(N, H, W, C), lo.reshape(N, H, W, C)


# ----------------------------------------------------------------------------
# conv dispatcher (im2col only for the two strided 3x3 convs)
# ----------------------------------------------------------------------------
def _im2col(x, k, stride, dilation, padding):
    # TODO(synk): strided 3x3 convs (stem conv1, layer2 b0 conv2) still go through
    # im2col; a strided variant of the direct kernel would avoid the 9x-wide copy.
    xp = jnp.pad(x, ((0, 0), (padding, padding), (padding, padding), (0, 0)))
    N, Hp, Wp, Cin = xp.shape
    Ho = (Hp - (dilation * (k - 1) + 1)) // stride + 1
    Wo = (Wp - (dilation * (k - 1) + 1)) // stride + 1
    cols = []
    for dy in range(k):
        for dx in range(k):
            cols.append(xp[:,
                           dy * dilation: dy * dilation + (Ho - 1) * stride + 1: stride,
                           dx * dilation: dx * dilation + (Wo - 1) * stride + 1: stride,
                           :])
    xm = jnp.concatenate(cols, axis=-1).reshape(N * Ho * Wo, k * k * Cin)
    return xm, N, Ho, Wo


def conv_bn_act(x, p, stride=1, dilation=1, padding=0, relu=True, residual=None):
    cout = p['cout']
    if p['kind'] == 'c3':                       # stride-1 3x3, padding == dilation
        return conv3x3_direct(x, p, dilation, relu)
    k = p['k']
    if k == 1:
        xs = x if stride == 1 else x[:, ::stride, ::stride, :]
        N, Ho, Wo, cin = xs.shape
        xm = xs.reshape(N * Ho * Wo, cin)
    else:                                       # strided 3x3 fallback (stem / layer2 b0)
        xm, N, Ho, Wo = _im2col(x, k, stride, dilation, padding)
    rm = None if residual is None else residual.reshape(N * Ho * Wo, cout)
    out = matmul_scale_bias_act(xm, p['wm'], p['s'], p['b'], cout, relu, rm)
    return out.reshape(N, Ho, Wo, cout)


# ----------------------------------------------------------------------------
# plain-JAX glue ops (no clean Pallas equivalent / negligible cost)
# ----------------------------------------------------------------------------
def max_pool_3x3_s2(x):
    # TODO(synk): window max-pool kept in plain JAX (lax.reduce_window glue).
    init = jnp.asarray(-jnp.inf, dtype=x.dtype)
    return lax.reduce_window(x, init, lax.max,
                             window_dimensions=(1, 3, 3, 1),
                             window_strides=(1, 2, 2, 1),
                             padding=((0, 0), (1, 1), (1, 1), (0, 0)))


def adaptive_avg_pool(x, out_size):
    # TODO(synk): PyTorch AdaptiveAvgPool2d region rule done with an einsum in JAX.
    N, H, W, C = x.shape

    def pool_mat(inp, out):
        m = np.zeros((out, inp), np.float32)
        for i in range(out):
            s = (i * inp) // out
            e = -((-(i + 1) * inp) // out)
            m[i, s:e] = 1.0 / (e - s)
        return jnp.asarray(m)

    Ph = pool_mat(H, out_size)
    Pw = pool_mat(W, out_size)
    return jnp.einsum('oh,nhwc,pw->nopc', Ph, x.astype(jnp.float32), Pw)


def bilinear_resize_ac(x, oh, ow):
    # TODO(synk): bilinear interpolation (align_corners=True) uses gathers; kept in JAX.
    N, H, W, C = x.shape
    dt = x.dtype
    xf = x.astype(jnp.float32)

    def grid(inp, out):
        if out == 1 or inp == 1:
            return jnp.zeros((out,), jnp.float32)
        return jnp.arange(out, dtype=jnp.float32) * ((inp - 1) / (out - 1))

    ys = grid(H, oh)
    xs = grid(W, ow)
    y0 = jnp.clip(jnp.floor(ys).astype(jnp.int32), 0, H - 1)
    x0 = jnp.clip(jnp.floor(xs).astype(jnp.int32), 0, W - 1)
    y1 = jnp.clip(y0 + 1, 0, H - 1)
    x1 = jnp.clip(x0 + 1, 0, W - 1)
    wy = (ys - y0.astype(jnp.float32))[None, :, None, None]
    wx = (xs - x0.astype(jnp.float32))[None, None, :, None]
    r0 = xf[:, y0]
    r1 = xf[:, y1]
    v00, v01 = r0[:, :, x0], r0[:, :, x1]
    v10, v11 = r1[:, :, x0], r1[:, :, x1]
    top = v00 * (1 - wx) + v01 * wx
    bot = v10 * (1 - wx) + v11 * wx
    return (top * (1 - wy) + bot * wy).astype(dt)


# ----------------------------------------------------------------------------
# deterministic parameter generation (BN folded; weights prepared/padded once)
# ----------------------------------------------------------------------------
def _prep(w, s, b, k, stride):
    kh, kw, cin, cout = w.shape
    if k == 3 and stride == 1:                          # direct-conv path
        return dict(kind='c3', cin=cin, cout=cout,
                    w9=w.reshape(9, cin, cout).astype(jnp.bfloat16),
                    s=s.reshape(1, cout).astype(jnp.float32),
                    b=b.reshape(1, cout).astype(jnp.float32))
    K = kh * kw * cin
    Kp = _round_up(K, 128)
    Np = _round_up(cout, 128)
    wm = jnp.zeros((Kp, Np), jnp.bfloat16).at[:K, :cout].set(
        w.reshape(K, cout).astype(jnp.bfloat16))
    sp = jnp.zeros((1, Np), jnp.float32).at[0, :cout].set(s)
    bp = jnp.zeros((1, Np), jnp.float32).at[0, :cout].set(b)
    return dict(kind='mm', k=kh, cin=cin, cout=cout, wm=wm, s=sp, b=bp)


class ParamGen:
    def __init__(self, seed=0):
        self.key = jax.random.PRNGKey(seed)
        self.n = 0

    def _next(self):
        self.n += 1
        return jax.random.fold_in(self.key, self.n)

    def conv_w(self, k, cin, cout):
        fan_in = k * k * cin
        return jax.random.normal(self._next(), (k, k, cin, cout),
                                 jnp.float32) / np.sqrt(fan_in)

    def bn(self, c):
        gamma = 1.0 + 0.1 * jax.random.normal(self._next(), (c,), jnp.float32)
        beta = 0.1 * jax.random.normal(self._next(), (c,), jnp.float32)
        mean = 0.1 * jax.random.normal(self._next(), (c,), jnp.float32)
        var = 1.0 + 0.1 * jnp.abs(jax.random.normal(self._next(), (c,), jnp.float32))
        scale = gamma / jnp.sqrt(var + 1e-5)
        bias = beta - mean * scale
        return scale, bias

    def conv_bn(self, k, cin, cout, stride=1):
        w = self.conv_w(k, cin, cout)
        s, b = self.bn(cout)
        return _prep(w, s, b, k, stride)

    def conv_plain(self, k, cin, cout, bias=False, stride=1):
        w = self.conv_w(k, cin, cout)
        s = jnp.ones((cout,), jnp.float32)
        b = (0.1 * jax.random.normal(self._next(), (cout,), jnp.float32)
             if bias else jnp.zeros((cout,), jnp.float32))
        return _prep(w, s, b, k, stride)


def make_bottleneck_params(pg, inplanes, planes, downsample, stride=1):
    p = dict(c1=pg.conv_bn(1, inplanes, planes),
             c2=pg.conv_bn(3, planes, planes, stride=stride),
             c3=pg.conv_bn(1, planes, planes * 4))
    if downsample:
        p['ds'] = pg.conv_bn(1, inplanes, planes * 4)
    return p


def make_layer_params(pg, inplanes, planes, blocks, stride=1):
    ps = [make_bottleneck_params(pg, inplanes, planes, True, stride)]
    for _ in range(blocks - 1):
        ps.append(make_bottleneck_params(pg, planes * 4, planes, False, 1))
    return ps


def build_params(seed=0, classes=19, blocks=(3, 4, 23, 3)):
    # TODO(synk): models.resnet101 (pretrained, deep-stem) is an external dependency of the
    # reference; its structure is reproduced with deterministic synthetic weights
    # (block counts 3-4-23-3, dilation hacks applied as in AFENet.__init__).
    pg = ParamGen(seed)
    P = {}
    P['stem'] = [pg.conv_bn(3, 3, 64, stride=2),
                 pg.conv_bn(3, 64, 64),
                 pg.conv_bn(3, 64, 128)]
    P['layer1'] = make_layer_params(pg, 128, 64, blocks[0], stride=1)
    P['layer2'] = make_layer_params(pg, 256, 128, blocks[1], stride=2)
    P['layer3'] = make_layer_params(pg, 512, 256, blocks[2], stride=1)
    P['layer4'] = make_layer_params(pg, 1024, 512, blocks[3], stride=1)
    P['ppm'] = [pg.conv_bn(1, 2048, 512) for _ in range(4)]
    P['ppm_reduce'] = pg.conv_bn(3, 4096, 256)

    def afem_params(h_in, l_in, out=256):
        return dict(convH=pg.conv_bn(1, h_in, out),
                    convL=pg.conv_bn(1, l_in, out),
                    convA=pg.conv_plain(1, out, out, bias=False),
                    conv=pg.conv_bn(3, 3 * out, out))

    P['aff1'] = afem_params(256, 1024)
    P['aff2'] = afem_params(1024, 512)
    P['aff3'] = afem_params(512, 256)
    P['cls'] = [pg.conv_bn(3, 1024, 256), pg.conv_plain(1, 256, classes, bias=True)]
    return P


# ----------------------------------------------------------------------------
# forward passes
# ----------------------------------------------------------------------------
def bottleneck_forward(x, bp, stride, dilation):
    out = conv_bn_act(x, bp['c1'], relu=True)
    out = conv_bn_act(out, bp['c2'], stride=stride, dilation=dilation,
                      padding=dilation, relu=True)
    identity = conv_bn_act(x, bp['ds'], stride=stride, relu=False) if 'ds' in bp else x
    # residual add + ReLU fused into the c3 matmul epilogue
    return conv_bn_act(out, bp['c3'], relu=True, residual=identity)


def run_layer(x, layer_params, stride, dilation):
    x = bottleneck_forward(x, layer_params[0], stride=stride, dilation=dilation)
    for bp in layer_params[1:]:
        x = bottleneck_forward(x, bp, stride=1, dilation=dilation)
    return x


def ppm_forward(p, x, bins=(1, 2, 3, 6)):
    # TODO(synk): the 4096-ch PPM concat (and the AFEM / head concats below) could be
    # fused into the consuming 3x3 conv's Cin grid axis to avoid an HBM round trip.
    N, H, W, C = x.shape
    outs = [x]
    for i, b in enumerate(bins):
        f = adaptive_avg_pool(x, b)
        f = conv_bn_act(f, p[i], relu=True)
        f = bilinear_resize_ac(f, H, W)
        outs.append(f)
    return jnp.concatenate(outs, axis=-1)


def afem_forward(p, h_x, l_x, l_stride=1):
    h = conv_bn_act(h_x, p['convH'], relu=True)                    # 1x1 + BN + ReLU
    l = conv_bn_act(l_x, p['convL'], stride=l_stride, relu=True)   # 1x1 + BN + ReLU
    a = conv_bn_act(l, p['convA'], relu=False)                     # 1x1 (no BN/ReLU)
    h2, f_la = attention_combine(a, h, l)   # softmax(W) -> mean(C) -> fused adds
    cat = jnp.concatenate([h2, f_la, l], axis=-1)
    return conv_bn_act(cat, p['conv'], dilation=1, relu=True)      # 3x3 direct


def afenet_forward(params, x_nchw):
    imsize = x_nchw.shape[2:]
    x = jnp.transpose(x_nchw, (0, 2, 3, 1)).astype(jnp.bfloat16)   # NCHW -> NHWC, bf16

    # layer0 (deep stem) + maxpool
    x = conv_bn_act(x, params['stem'][0], stride=2, padding=1, relu=True)
    x = conv_bn_act(x, params['stem'][1], relu=True)
    x = conv_bn_act(x, params['stem'][2], relu=True)
    x = max_pool_3x3_s2(x)

    c1 = run_layer(x, params['layer1'], stride=1, dilation=1)       # 256 ch, /4
    c2 = run_layer(c1, params['layer2'], stride=2, dilation=1)      # 512 ch, /8
    x_temp = run_layer(c2, params['layer3'], stride=1, dilation=2)  # 1024 ch, /8
    c4 = run_layer(x_temp, params['layer4'], stride=1, dilation=4)  # 2048 ch, /8

    c4 = ppm_forward(params['ppm'], c4)                             # 4096 ch
    c4 = conv_bn_act(c4, params['ppm_reduce'], relu=True)           # 256 ch

    c1 = afem_forward(params['aff3'], c2, c1, l_stride=2)
    c2 = afem_forward(params['aff2'], x_temp, c2, l_stride=1)
    c3 = afem_forward(params['aff1'], c4, x_temp, l_stride=1)

    # c3 = c4 + c3 ; c2 = c3 + c2 ; c1 = c2 + c1   (one fused bf16 pass)
    c3, c2, c1 = fused_add_cascade(c4, c3, c2, c1)

    xc = jnp.concatenate([c1, c2, c3, c4], axis=-1)                 # 1024 ch
    xc = conv_bn_act(xc, params['cls'][0], relu=True)
    # Dropout2d(p=0.1) is identity in eval mode (inference path implemented)
    xc = conv_bn_act(xc, params['cls'][1], relu=False)              # 1x1, with bias
    xc = bilinear_resize_ac(xc, imsize[0], imsize[1])
    return jnp.transpose(xc, (0, 3, 1, 2)).astype(jnp.float32)      # NHWC -> NCHW


# ----------------------------------------------------------------------------
if __name__ == "__main__":
    key = jax.random.PRNGKey(0)
    x = jax.random.normal(key, (2, 3, 32, 32), jnp.float32)   # NCHW like PyTorch
    params = build_params(seed=0, classes=19)
    out = afenet_forward(params, x)
    out = jax.block_until_ready(out)
    assert out.shape == (2, 19, 32, 32), out.shape
    assert bool(jnp.all(jnp.isfinite(out)))
    print("KERNEL_OK")
</pallas_src>

<mosaic_0001>
module attributes {stable_mosaic.version = 11 : i64} {
  func.func @kernel(%arg0: i32, %arg1: i32, %arg2: i32, %arg3: memref<256x128xbf16, #tpu.memory_space<vmem>>, %arg4: memref<128x128xbf16, #tpu.memory_space<vmem>>, %arg5: memref<1x128xf32, #tpu.memory_space<vmem>>, %arg6: memref<1x128xf32, #tpu.memory_space<vmem>>, %arg7: memref<256x128xbf16, #tpu.memory_space<vmem>>, %arg8: memref<256x128xf32, #tpu.memory_space<vmem>>) attributes {dimension_semantics = [#tpu.dimension_semantics<parallel>, #tpu.dimension_semantics<parallel>, #tpu.dimension_semantics<arbitrary>], iteration_bounds = array<i64: 2, 1, 1>, scalar_prefetch = 0 : i64, scratch_operands = 1 : i64, tpu.core_type = #tpu.core_type<tc>, window_params = [{transform_indices = @transform_0, window_bounds = array<i64: 256, 128>}, {transform_indices = @transform_1, window_bounds = array<i64: 128, 128>}, {transform_indices = @transform_2, window_bounds = array<i64: 1, 128>}, {transform_indices = @transform_3, window_bounds = array<i64: 1, 128>}, {transform_indices = @transform_4, window_bounds = array<i64: 256, 128>}]} {
    %c0 = arith.constant 0 : index
    %c0_0 = arith.constant 0 : index
    %0 = vector.load %arg3[%c0, %c0_0] : memref<256x128xbf16, #tpu.memory_space<vmem>>, vector<256x128xbf16>
    %c0_1 = arith.constant 0 : index
    %c0_2 = arith.constant 0 : index
    %1 = vector.load %arg4[%c0_1, %c0_2] : memref<128x128xbf16, #tpu.memory_space<vmem>>, vector<128x128xbf16>
    %cst = arith.constant dense<0.000000e+00> : vector<256x128xf32>
    %2 = tpu.matmul %0, %1, %cst {dimension_numbers = #tpu.dot_dimension_numbers<[1], [0], [0], [1], [0, 0, 1, 1], [], []>} : vector<256x128xbf16>, vector<128x128xbf16>, vector<256x128xf32> -> vector<256x128xf32>
    %c0_i32 = arith.constant 0 : i32
    %3 = arith.cmpi eq, %arg2, %c0_i32 : i32
    %4 = arith.extui %3 : i1 to i32
    %c0_i32_3 = arith.constant 0 : i32
    %5 = arith.cmpi ne, %4, %c0_i32_3 : i32
    scf.if %5 {
      %c0_8 = arith.constant 0 : index
      %c0_9 = arith.constant 0 : index
      %12 = vector.load %arg8[%c0_8, %c0_9] : memref<256x128xf32, #tpu.memory_space<vmem>>, vector<256x128xf32>
      tpu.vector_store %arg8[%c0_8, %c0_9], %2 {strides = array<i32>} : memref<256x128xf32, #tpu.memory_space<vmem>>, vector<256x128xf32>,
    } else {
    }
    %c0_i32_4 = arith.constant 0 : i32
    %6 = arith.cmpi sgt, %arg2, %c0_i32_4 : i32
    %7 = arith.extui %6 : i1 to i32
    %c0_i32_5 = arith.constant 0 : i32
    %8 = arith.cmpi ne, %7, %c0_i32_5 : i32
    scf.if %8 {
      %c0_8 = arith.constant 0 : index
      %c0_9 = arith.constant 0 : index
      %12 = vector.load %arg8[%c0_8, %c0_9] : memref<256x128xf32, #tpu.memory_space<vmem>>, vector<256x128xf32>
      %13 = arith.addf %12, %2 : vector<256x128xf32>
      %c0_10 = arith.constant 0 : index
      %c0_11 = arith.constant 0 : index
      %14 = vector.load %arg8[%c0_10, %c0_11] : memref<256x128xf32, #tpu.memory_space<vmem>>, vector<256x128xf32>
      tpu.vector_store %arg8[%c0_10, %c0_11], %13 {strides = array<i32>} : memref<256x128xf32, #tpu.memory_space<vmem>>, vector<256x128xf32>,
    } else {
    }
    %c0_i32_6 = arith.constant 0 : i32
    %9 = arith.cmpi eq, %arg2, %c0_i32_6 : i32
    %10 = arith.extui %9 : i1 to i32
    %c0_i32_7 = arith.constant 0 : i32
    %11 = arith.cmpi ne, %10, %c0_i32_7 : i32
    scf.if %11 {
      %c0_8 = arith.constant 0 : index
      %c0_9 = arith.constant 0 : index
      %12 = vector.load %arg8[%c0_8, %c0_9] : memref<256x128xf32, #tpu.memory_space<vmem>>, vector<256x128xf32>
      %c0_10 = arith.constant 0 : index
      %c0_11 = arith.constant 0 : index
      %13 = vector.load %arg5[%c0_10, %c0_11] : memref<1x128xf32, #tpu.memory_space<vmem>>, vector<1x128xf32>
      %14 = vector.broadcast %13 : vector<1x128xf32> to vector<256x128xf32>
      %15 = arith.mulf %12, %14 : vector<256x128xf32>
      %c0_12 = arith.constant 0 : index
      %c0_13 = arith.constant 0 : index
      %16 = vector.load %arg6[%c0_12, %c0_13] : memref<1x128xf32, #tpu.memory_space<vmem>>, vector<1x128xf32>
      %17 = vector.broadcast %16 : vector<1x128xf32> to vector<256x128xf32>
      %18 = arith.addf %15, %17 : vector<256x128xf32>
      %cst_14 = arith.constant 0.000000e+00 : f32
      %19 = vector.broadcast %cst_14 : f32 to vector<256x128xf32>
      %20 = arith.maximumf %18, %19 : vector<256x128xf32>
      %21 = arith.truncf %20 : vector<256x128xf32> to vector<256x128xbf16>
      %c0_15 = arith.constant 0 : index
      %c0_16 = arith.constant 0 : index
      %22 = vector.load %arg7[%c0_15, %c0_16] : memref<256x128xbf16, #tpu.memory_space<vmem>>, vector<256x128xbf16>
      tpu.vector_store %arg7[%c0_15, %c0_16], %21 {strides = array<i32>} : memref<256x128xbf16, #tpu.memory_space<vmem>>, vector<256x128xbf16>,
    } else {
    }
    return
  }
  func.func @transform_0(%arg0: i32, %arg1: i32, %arg2: i32) -> (i32, i32) {
    %c0_i32 = arith.constant 0 : i32
    return %arg0, %arg2 : i32, i32
  }
  func.func @transform_1(%arg0: i32, %arg1: i32, %arg2: i32) -> (i32, i32) {
    %c0_i32 = arith.constant 0 : i32
    return %arg2, %arg1 : i32, i32
  }
  func.func @transform_2(%arg0: i32, %arg1: i32, %arg2: i32) -> (i32, i32) {
    %c0_i32 = arith.constant 0 : i32
    %c0_i32_0 = arith.constant 0 : i32
    return %c0_i32, %arg1 : i32, i32
  }
  func.func @transform_3(%arg0: i32, %arg1: i32, %arg2: i32) -> (i32, i32) {
    %c0_i32 = arith.constant 0 : i32
    %c0_i32_0 = arith.constant 0 : i32
    return %c0_i32, %arg1 : i32, i32
  }
  func.func @transform_4(%arg0: i32, %arg1: i32, %arg2: i32) -> (i32, i32) {
    %c0_i32 = arith.constant 0 : i32
    return %arg0, %arg1 : i32, i32
  }
}

</mosaic_0001>

<bundles_post_ra>
// kernel: tpu_custom_call.1
= control target key start
LH: loop header
LB: loop body
LE: loop exit
PB: predicated region body
PF: predicated region fallthrough
CT: control target
= control target key end

     0   :  { %9 = vsyncpa [#allocation4], 0  ;;  %s2146_s0 = inlined_call_operand.hbm [shape: bf16[512,128], index: 0, kind: input, shape index: {}]   ;;  %s2147_s1 = inlined_call_operand.hbm [shape: bf16[128,128], index: 1, kind: input, shape index: {}]   ;;  %s2148_s2 = inlined_call_operand.vmem [shape: f32[1,128], index: 2, kind: input, shape index: {}]   ;;  %s2149_s3 = inlined_call_operand.vmem [shape: f32[1,128], index: 3, kind: input, shape index: {}]   ;;  %s2150_s4 = inlined_call_operand.hbm [shape: bf16[512,128], index: 4, kind: output, shape index: {}]  }
   0x1   :  { %11 = vsyncpa [#allocation4 + $0x1], 0 }
   0x2   :  { %12 = vsyncpa [#allocation7], 0 }
   0x3   :  { %13 = vsyncpa [#allocation5], 0 }
   0x4   :  { %15 = vsyncpa [#allocation5 + $0x1], 0  ;;  %s1806_s15 = smov 0   ;;  %s1808_s16 = smov 0  }
   0x5   :  { %s1810_s17 = smov 0   ;;  %s1812_s18 = smov 0  }
   0x6   :  { %s1814_s19 = smov 0   ;;  %s1816_s20 = smov 0  }
   0x7 LB: > { %s1233_s21 = sadd.s32 4294967295, %s1772_s20   ;;  %s1234_s22 = sadd.s32 4294967294, %s1772_s20   ;;  %s1772_s20 = sphi %s1816_s20, %s21_s20   ;;  %s1768_s19 = sphi %s1814_s19, %s2174_s19   ;;  %s1764_s18 = sphi %s1812_s18, %s2173_s18   ;;  %s1760_s17 = sphi %s1810_s17, %s2172_s17   ;;  %s1756_s16 = sphi %s1808_s16, %s2171_s16   ;;  %s1752_s15 = sphi %s1806_s15, %s2170_s15  }
   0x8   : > { %p62_p0 = scmp.ne.s32.totalorder %s1756_s16, %s1752_s15  ;;  %p1840_p1 = scmp.eq.s32.totalorder %s1233_s21, 0 }
   0x9   : > { %p1844_p2 = scmp.eq.s32.totalorder %s1233_s21, 1  ;;  %p174_p3 = scmp.eq.s32.totalorder %s1234_s22, 1 }
   0xa   : > { %s2155_s23 = scalar_select %p1840_p1, 1, 0 }
   0xb   : > { %s2156_s24 = scalar_select %p1844_p2, 1, 0 }
   0xc   : > { %p1850_p4 = por %p1840_p1, %p62_p0  ;;  %p1235_p5 = scmp.ge.s32.totalorder %s1772_s20, 1 }
   0xd   : > { %p1855_p6 = por %p174_p3, %p62_p0  ;;  %p181_p7 = scmp.lt.s32.totalorder %s1772_s20, 3 }
   0xe   : > { %s2157_s25 = scalar_select %p1850_p4, 1, 0 }
   0xf   : > { %s2158_s26 = scalar_select %p1855_p6, 1, 0 }
  0x10   : > { %p1860_p8 = pnand %p1235_p5, %p181_p7  ;;  %s1774_s28 = smov [#allocation6]  }
  0x11   : > { %s197_s29 = sshll.u32 %s1774_s28, 4  ;;  %s40_s5 = sadd.s32 1, %s1768_s19  ;;  %s198_s29 = int_to_ptr.vmem [resolvable:$true] %s197_s29 }
  0x12   : > { %s2159_s27 = scalar_select %p1860_p8, 1, 0 }
  0x13   : > { %p1535_p9 = pneg %p1860_p8  ;;  %s1628_s8 = scalar_lea.hbm %s2147_s1, 1024 }
  0x14   : > { %p1629_p12 = scmp.ne.s32.totalorder %s2147_s1, %s1628_s8  ;;  %p1635_p5 = scmp.lt.u32.totalorder %s1628_s8, %s2147_s1 }
  0x15   : > { %p1869_p11 = pnand %p1535_p9, %p1840_p1 }
  0x17   : > { %p1630_p13 = pneg %p1869_p11 }
  0x19   : > { %p1631_p0 = pnand %p1630_p13, %p1629_p12 }
  0x1b   : > { %p1632_p3 = pneg %p1631_p0 }
  0x1d   : > { %p1637_p7 = pnand %p1635_p5, %p1632_p3 }
  0x1f   : > { %1640 = shalt.err (!%p1637_p7)
}
  0x20   : > { %s1641_s13 = scalar_lea.vmem %s198_s29, 1024  ;;  %p1649_p1 = scmp.lt.s32.totalorder %s198_s29, %s198_s29 }
  0x21   : > { %p1642_p9 = scmp.ne.s32.totalorder %s198_s29, %s1641_s13  ;;  %p1650_p4 = scmp.lt.s32.totalorder %s1641_s13, %s1641_s13 }
  0x23   : > { %p1644_p10 = pnand %p1642_p9, %p1630_p13  ;;  %p1651_p8 = por %p1650_p4, %p1649_p1 }
  0x25   : > { %p1645_p6 = pneg %p1644_p10 }
  0x27   : > { %p1652_p2 = pnand %p1651_p8, %p1645_p6 }
  0x29   : > { %1655 = shalt.err (!%p1652_p2)
}
  0x2a   : > { %s1775_s14 = smov 64   ;;  %s1776_s21 = smov 4  }
  0x2b   : > { %1538 = dma.hbm_to_vmem [thread:$0]  (!%p1869_p11), %s2147_s1, 1024, %s198_s29, [#allocation7], %s1775_s14, %s1775_s14, %s1776_s21  }
  0x2c   : > { %p42_p1 = scmp.ge.s32.totalorder %s40_s5, 2  ;;  %s49_s6 = sadd.s32 1, %s1760_s17 }
  0x2d   : > { %p56_p2 = scmp.ne.s32.totalorder %s1760_s17, %s1756_s16  ;;  %p57_p4 = scmp.eq.s32.totalorder %s1772_s20, 0 }
  0x2e   : > { %s2176_s5 = smov (%p42_p1, %s40_s5), 0  ;;  %p2162_p8 = scmp.ne.s32.totalorder %s2156_s24, 0 }
  0x2f   : > { %p1899_p6 = por %p57_p4, %p56_p2  ;;  %s44_s8 = ssub.s32 %s1768_s19, %s2176_s5 }
  0x30   : > { %p1905_p10 = por %p2162_p8, %p56_p2  ;;  %p1548_p12 = scmp.lt.s32.totalorder %s1772_s20, 2 }
  0x31   : > { %p47_p11 = scmp.eq.s32.totalorder %s44_s8, 0  ;;  %s223_s29 = sand.u32 1, %s1760_s17  }
  0x32   : > { %s1240_s9 = sshll.u32 %s223_s29, 7  ;;  %s1310_s11 = sshll.u32 %s1768_s19, 11 }
  0x33   : > { %s1914_s10 = scalar_select %p47_p11, %s1760_s17, %s49_s6  }
  0x34   : > { %s1920_s22 = scalar_lea.hbm %s2146_s0, %s1310_s11  ;;  %s227_s24 = scalar_lea.vmem [#allocation3], %s1240_s9 }
  0x35   : > { %s235_s28 = sshll.u32 %s227_s24, 4  ;;  %p1926_p13 = pnand %p1548_p12, %p1899_p6  ;;  %s1922_s28 = int_to_ptr.vmem [resolvable:$true] %s235_s28 }
  0x36   : > { %s1930_s6 = scalar_lea.sflag [#allocation4], %s223_s29  ;;  %s1656_s12 = scalar_lea.hbm %s1920_s22, 2048 }
  0x37   : > { %p1657_p0 = scmp.ne.s32.totalorder %s1920_s22, %s1656_s12  ;;  %p1658_p3 = pneg %p1926_p13 }
  0x38   : > { %s1661_s7 = scalar_lea.hbm %s2146_s0, 4096  ;;  %p1662_p9 = scmp.lt.u32.totalorder %s1920_s22, %s2146_s0 }
  0x39   : > { %p1659_p5 = pnand %p1658_p3, %p1657_p0  ;;  %p1663_p1 = scmp.lt.u32.totalorder %s1661_s7, %s1656_s12 }
  0x3a   : > { %p1665_p4 = scmp.lt.u32.totalorder %s1656_s12, %s1920_s22 }
  0x3b   : > { %p1660_p7 = pneg %p1659_p5  ;;  %p1664_p2 = por %p1663_p1, %p1662_p9 }
  0x3d   : > { %p1666_p6 = por %p1665_p4, %p1664_p2 }
  0x3f   : > { %p1667_p8 = pnand %p1666_p6, %p1660_p7 }
  0x41   : > { %1670 = shalt.err (!%p1667_p8)
}
  0x42   : > { %s1671_s29 = scalar_lea.vmem %s1922_s28, 2048  ;;  %s1777_s9 = smov [#allocation3]  }
  0x43   : > { %p1672_p12 = scmp.ne.s32.totalorder %s1922_s28, %s1671_s29  ;;  %s1676_s11 = sshll.u32 %s1777_s9, 4  ;;  %s1677_s11 = int_to_ptr.vmem [resolvable:$false] %s1676_s11 }
  0x44   : > { %s1678_s13 = scalar_lea.vmem %s1677_s11, 4096  ;;  %p1679_p5 = scmp.lt.s32.totalorder %s1922_s28, %s1677_s11 }
  0x45   : > { %p1674_p11 = pnand %p1672_p12, %p1658_p3  ;;  %p1680_p9 = scmp.lt.s32.totalorder %s1678_s13, %s1671_s29 }
  0x47   : > { %p1675_p0 = pneg %p1674_p11  ;;  %p1681_p1 = por %p1680_p9, %p1679_p5 }
  0x49   : > { %p1682_p2 = pnand %p1681_p1, %p1675_p0 }
  0x4b   : > { %1685 = shalt.err (!%p1682_p2)
}
  0x4c   : > { %1542 = dma.hbm_to_vmem [thread:$0]  (!%p1926_p13), %s1920_s22, 2048, %s1922_s28, %s1930_s6, %s1775_s14, %s1775_s14, %s1776_s21  }
  0x4d   : > { %p2165_p3 = scmp.ne.s32.totalorder %s2159_s27, 0 }
  0x4e   : > { %s1964_s12 = sand.u32 (!%p2165_p3), 1, %s1756_s16   ;;  %p2166_p7 = scmp.ne.s32.totalorder (!%p2165_p3), %s2157_s25, 0 }
  0x4f   : > { %247 = sbr.rel (%p2165_p3) target bundleno = 386 (0x182), region = 36  ;;  %s1244_s7 = sshll.u32 (!%p2165_p3), %s1964_s12, 7 }
  0x50   : > { %s250_s24 = scalar_lea.sflag (!%p2165_p3), [#allocation4], %s1964_s12  ;;  %s1970_s8 = scalar_lea.vmem (!%p2165_p3), [#allocation3], %s1244_s7 }
  0x56   : > { %1739 = dma.done.wait (%p2166_p7), %s250_s24, 2048  }
  0x57   : > { %1741 = vsyncadd (%p2166_p7), %s250_s24, 4294965248  ;;  %p2167_p13 = scmp.ne.s32.totalorder %s2155_s23, 0 }
  0x59   : > { %1743 = dma.done.wait (%p2167_p13), [#allocation7], 1024  }
  0x5a   : > { %1745 = vsyncadd (%p2167_p13), [#allocation7], 4294966272  ;;  %v1604_v0 = vld [vmem:[#allocation6] sm:$0xff]   ;;  %v1605_v1 = vld [vmem:[#allocation6 + $0x8] sm:$0xff]   ;;  %s2028_s21 = scalar_lea.vmem [#allocation8], %s1244_s7  ;;  %s1343_s22 = sshll.u32 %s1764_s18, 11 }
  0x5b   : > { %1463 = vmatprep.subr.bf16.mxu0 %v1604_v0  ;;  %1511 = vmatprep.subr.bf16.mxu1 %v1604_v0  ;;  %v1606_v2 = vld [vmem:[#allocation6 + $0x10] sm:$0xff]   ;;  %v1607_v3 = vld [vmem:[#allocation6 + $0x18] sm:$0xff]   ;;  %v1612_v4 = vld [vmem:[%s1970_s8] sm:$0xff]   ;;  %s1107_s28 = sshll.u32 %s2028_s21, 4  ;;  %s2091_s18 = scalar_lea.hbm %s2150_s4, %s1343_s22  ;;  %s2093_s28 = int_to_ptr.vmem [resolvable:$true] %s1107_s28 }
  0x5c   : > { %1464 = vmatpush3.bf16.msra.mxu0 %v1604_v0  ;;  %1519 = vmatpush3.bf16.msra.mxu1 %v1604_v0  ;;  %v1613_v5 = vld [vmem:[%s1970_s8 + $0x40] sm:$0xff]   ;;  %v1609_v7 = vld [vmem:[#allocation6 + $0x28] sm:$0xff]   ;;  %v1610_v8 = vld [vmem:[#allocation6 + $0x30] sm:$0xff]   ;;  %s1093_s9 = scalar_lea.sflag [#allocation5], %s1964_s12  ;;  %s1686_s11 = scalar_lea.vmem %s2093_s28, 2048 }
  0x5d   : > { %1465 = vmatprep.subr.bf16.mxu0 %v1605_v1  ;;  %1512 = vmatprep.subr.bf16.mxu1 %v1605_v1  ;;  %v1608_v6 = vld [vmem:[#allocation6 + $0x20] sm:$0xff]   ;;  %v1611_v9 = vld [vmem:[#allocation6 + $0x38] sm:$0xff]   ;;  %v1614_v10 = vld [vmem:[%s1970_s8 + $0x8] sm:$0xff]   ;;  %p1687_p4 = scmp.ne.s32.totalorder %s2093_s28, %s1686_s11  ;;  %s1778_s13 = smov [#allocation8]  }
  0x5e   : > { %1479 = vmatprep.mubr.bf16.mxu0 %v1612_v4  ;;  %1495 = vmatprep.mubr.bf16.mxu1 %v1613_v5  ;;  %v1615_v11 = vld [vmem:[%s1970_s8 + $0x48] sm:$0xff]   ;;  %v1616_v12 = vld [vmem:[%s1970_s8 + $0x10] sm:$0xff]   ;;  %v1618_v14 = vld [vmem:[%s1970_s8 + $0x18] sm:$0xff]   ;;  %s1690_s7 = sshll.u32 %s1778_s13, 4  ;;  %s1691_s7 = int_to_ptr.vmem [resolvable:$false] %s1690_s7 }
  0x5f   : > { %v1617_v13 = vld [vmem:[%s1970_s8 + $0x50] sm:$0xff]   ;;  %v1619_v15 = vld [vmem:[%s1970_s8 + $0x58] sm:$0xff]   ;;  %v1620_v16 = vld [vmem:[%s1970_s8 + $0x20] sm:$0xff]   ;;  %p1688_p6 = pnand %p1687_p4, %p1905_p10  ;;  %s1692_s24 = scalar_lea.vmem %s1691_s7, 4096 }
  0x60   : > { %1466 = vmatpush3.bf16.msra.mxu0 %v1605_v1  ;;  %1520 = vmatpush3.bf16.msra.mxu1 %v1605_v1  ;;  %v1621_v17 = vld [vmem:[%s1970_s8 + $0x60] sm:$0xff]   ;;  %v1622_v18 = vld [vmem:[%s1970_s8 + $0x28] sm:$0xff]   ;;  %v1624_v20 = vld [vmem:[%s1970_s8 + $0x30] sm:$0xff]   ;;  %p1693_p12 = scmp.lt.s32.totalorder %s2093_s28, %s1691_s7  ;;  %p1694_p11 = scmp.lt.s32.totalorder %s1692_s24, %s1686_s11 }
  0x61   : > { %1467 = vmatprep.subr.bf16.mxu0 %v1606_v2  ;;  %1513 = vmatprep.subr.bf16.mxu1 %v1606_v2  ;;  %v1623_v19 = vld [vmem:[%s1970_s8 + $0x68] sm:$0xff]   ;;  %v1625_v21 = vld [vmem:[%s1970_s8 + $0x70] sm:$0xff]   ;;  %v1626_v22 = vld [vmem:[%s1970_s8 + $0x38] sm:$0xff]   ;;  %p1689_p8 = pneg %p1688_p6 }
  0x62   : > { %v1627_v23 = vld [vmem:[%s1970_s8 + $0x78] sm:$0xff]   ;;  %v1999_v24 = vld [vmem:[%s2148_s2] ss:$0 sm:$0xff]  ;;  %p1695_p0 = por %p1694_p11, %p1693_p12 }
  0x63   : > { %v2004_v26 = vld [vmem:[%s2149_s3] ss:$0 sm:$0xff] }
  0x64   : > { %1468 = vmatpush3.bf16.msra.mxu0 %v1606_v2  ;;  %1521 = vmatpush3.bf16.msra.mxu1 %v1606_v2  ;;  %p1696_p5 = pnand %p1695_p0, %p1689_p8 }
  0x65   : > { %1469 = vmatprep.subr.bf16.mxu0 %v1607_v3  ;;  %1514 = vmatprep.subr.bf16.mxu1 %v1607_v3 }
  0x68   : > { %1470 = vmatpush3.bf16.msra.mxu0 %v1607_v3  ;;  %1522 = vmatpush3.bf16.msra.mxu1 %v1607_v3 }
  0x69   : > { %1471 = vmatprep.subr.bf16.mxu0 %v1608_v6  ;;  %1515 = vmatprep.subr.bf16.mxu1 %v1608_v6 }
  0x6c   : > { %1472 = vmatpush3.bf16.msra.mxu0 %v1608_v6  ;;  %1523 = vmatpush3.bf16.msra.mxu1 %v1608_v6 }
  0x6d   : > { %1473 = vmatprep.subr.bf16.mxu0 %v1609_v7  ;;  %1516 = vmatprep.subr.bf16.mxu1 %v1609_v7 }
  0x70   : > { %1474 = vmatpush3.bf16.msra.mxu0 %v1609_v7  ;;  %1524 = vmatpush3.bf16.msra.mxu1 %v1609_v7 }
  0x71   : > { %1475 = vmatprep.subr.bf16.mxu0 %v1610_v8  ;;  %1517 = vmatprep.subr.bf16.mxu1 %v1610_v8 }
  0x74   : > { %1476 = vmatpush3.bf16.msra.mxu0 %v1610_v8  ;;  %1525 = vmatpush3.bf16.msra.mxu1 %v1610_v8 }
  0x75   : > { %1477 = vmatprep.subr.bf16.mxu0 %v1611_v9  ;;  %1518 = vmatprep.subr.bf16.mxu1 %v1611_v9 }
  0x78   : > { %1478 = vmatpush3.bf16.msra.mxu0 %v1611_v9  ;;  %1526 = vmatpush3.bf16.msra.mxu1 %v1611_v9 }
  0x7b   : > { %1480 = vmatmul.mubr.bf16.vlgmr.msra.gmra.mrb[0].mxu0 %v1614_v10  ;;  %1496 = vmatmul.mubr.bf16.vlgmr.msra.gmra.mrb[0].mxu1 %v1615_v11 }
  0x7c   : > { %1483 = vmatprep.mubr.bf16.mxu0 %v1616_v12  ;;  %1499 = vmatprep.mubr.bf16.mxu1 %v1617_v13 }
  0x83   : > { %1484 = vmatmul.mubr.bf16.gmra.mrb[4].mxu0 %v1618_v14  ;;  %1500 = vmatmul.mubr.bf16.gmra.mrb[4].mxu1 %v1619_v15 }
  0x84   : > { %1487 = vmatprep.mubr.bf16.mxu0 %v1620_v16  ;;  %1503 = vmatprep.mubr.bf16.mxu1 %v1621_v17 }
  0x8b   : > { %1488 = vmatmul.mubr.bf16.gmra.mrb[8].mxu0 %v1622_v18  ;;  %1504 = vmatmul.mubr.bf16.gmra.mrb[8].mxu1 %v1623_v19 }
  0x8c   : > { %1491 = vmatprep.mubr.bf16.mxu0 %v1624_v20  ;;  %1507 = vmatprep.mubr.bf16.mxu1 %v1625_v21 }
  0x93   : > { %1492 = vmatmul.mubr.bf16.gmra.mrb[12].mxu0 %v1626_v22  ;;  %1508 = vmatmul.mubr.bf16.gmra.mrb[12].mxu1 %v1627_v23 }
 0x14e   : > { %v1481_v25 = vpop.f32.mrb[0].mxu0  ;;  %v1497_v27 = vpop.f32.mrb[0].mxu1 }
 0x14f   : > { %v831_v28 = vmul.f32 %v1481_v25, %v1999_v24  ;;  %v847_v29 = vmul.f32 %v1497_v27, %v1999_v24  ;;  %v524_v30 = vpop.f32.mrb[1].mxu0  ;;  %v588_v31 = vpop.f32.mrb[1].mxu1 }
 0x150   : > { %v829_v32 = vmul.f32 %v1999_v24, %v524_v30  ;;  %v845_v33 = vmul.f32 %v1999_v24, %v588_v31  ;;  %v1482_v34 = vpop.f32.mrb[2].mxu0  ;;  %v1498_v35 = vpop.f32.mrb[2].mxu1 }
 0x151   : > { %v870_v36 = vadd.f32 %v2004_v26, %v831_v28  ;;  %v886_v37 = vadd.f32 %v2004_v26, %v847_v29  ;;  %v832_v38 = vmul.f32 %v1482_v34, %v1999_v24  ;;  %v848_v39 = vmul.f32 %v1498_v35, %v1999_v24  ;;  %v527_v40 = vpop.f32.mrb[3].mxu0  ;;  %v591_v41 = vpop.f32.mrb[3].mxu1 }
 0x152   : > { %v868_v42 = vadd.f32 %v2004_v26, %v829_v32  ;;  %v884_v43 = vadd.f32 %v2004_v26, %v845_v33  ;;  %v830_v44 = vmul.f32 %v1999_v24, %v527_v40  ;;  %v846_v45 = vmul.f32 %v1999_v24, %v591_v41 }
 0x153   : > { %v871_v46 = vadd.f32 %v2004_v26, %v832_v38  ;;  %v887_v47 = vadd.f32 %v2004_v26, %v848_v39  ;;  %v902_v50 = vmax.f32 %v870_v36, 0.0  ;;  %v918_v51 = vmax.f32 %v886_v37, 0.0 }
 0x154   : > { %v869_v48 = vadd.f32 %v2004_v26, %v830_v44  ;;  %v885_v49 = vadd.f32 %v2004_v26, %v846_v45  ;;  %v900_v54 = vmax.f32 %v868_v42, 0.0  ;;  %v916_v55 = vmax.f32 %v884_v43, 0.0 }
 0x155   : > { %v903_v52 = vmax.f32 %v871_v46, 0.0  ;;  %v919_v53 = vmax.f32 %v887_v47, 0.0 }
 0x156   : > { %v901_v56 = vmax.f32 %v869_v48, 0.0  ;;  %v917_v57 = vmax.f32 %v885_v49, 0.0  ;;  %v1485_v58 = vpop.f32.mrb[4].mxu0  ;;  %v1501_v59 = vpop.f32.mrb[4].mxu1 }
 0x157   : > { %v1352_v60 = vpack.c.bf16 %v903_v52, %v902_v50  ;;  %v1392_v61 = vpack.c.bf16 %v919_v53, %v918_v51  ;;  %v835_v62 = vmul.f32 %v1485_v58, %v1999_v24  ;;  %v851_v63 = vmul.f32 %v1501_v59, %v1999_v24  ;;  %v540_v0 = vpop.f32.mrb[5].mxu0  ;;  %v604_v1 = vpop.f32.mrb[5].mxu1 }
 0x158   : > { %v1347_v2 = vpack.c.bf16 %v901_v56, %v900_v54  ;;  %v1387_v3 = vpack.c.bf16 %v917_v57, %v916_v55  ;;  %v833_v4 = vmul.f32 %v1999_v24, %v540_v0  ;;  %v849_v5 = vmul.f32 %v1999_v24, %v604_v1  ;;  %v1486_v6 = vpop.f32.mrb[6].mxu0  ;;  %v1502_v7 = vpop.f32.mrb[6].mxu1 }
 0x159   : > { %1424 = vst [vmem:[%s2028_s21 + $0x8] sm:$0xff] %v1352_v60   ;;  %1432 = vst [vmem:[%s2028_s21 + $0x48] sm:$0xff] %v1392_v61   ;;  %v874_v8 = vadd.f32 %v2004_v26, %v835_v62  ;;  %v890_v9 = vadd.f32 %v2004_v26, %v851_v63  ;;  %v836_v10 = vmul.f32 %v1486_v6, %v1999_v24  ;;  %v543_v12 = vpop.f32.mrb[7].mxu0  ;;  %v607_v13 = vpop.f32.mrb[7].mxu1 }
 0x15a   : > { %v852_v11 = vmul.f32 %v1502_v7, %v1999_v24  ;;  %1348 = vst [vmem:[%s2028_s21] sm:$0xff] %v1347_v2   ;;  %1431 = vst [vmem:[%s2028_s21 + $0x40] sm:$0xff] %v1387_v3   ;;  %v872_v14 = vadd.f32 %v2004_v26, %v833_v4  ;;  %v888_v15 = vadd.f32 %v2004_v26, %v849_v5 }
 0x15b   : > { %v834_v16 = vmul.f32 %v1999_v24, %v543_v12  ;;  %v850_v17 = vmul.f32 %v1999_v24, %v607_v13  ;;  %v875_v18 = vadd.f32 %v2004_v26, %v836_v10  ;;  %v906_v22 = vmax.f32 %v874_v8, 0.0 }
 0x15c   : > { %v891_v19 = vadd.f32 %v2004_v26, %v852_v11  ;;  %v922_v23 = vmax.f32 %v890_v9, 0.0  ;;  %v904_v28 = vmax.f32 %v872_v14, 0.0  ;;  %v920_v29 = vmax.f32 %v888_v15, 0.0 }
 0x15d   : > { %v873_v20 = vadd.f32 %v2004_v26, %v834_v16  ;;  %v889_v21 = vadd.f32 %v2004_v26, %v850_v17  ;;  %v907_v25 = vmax.f32 %v875_v18, 0.0 }
 0x15e   : > { %v923_v27 = vmax.f32 %v891_v19, 0.0  ;;  %v1489_v32 = vpop.f32.mrb[8].mxu0  ;;  %v1505_v33 = vpop.f32.mrb[8].mxu1 }
 0x15f   : > { %v905_v30 = vmax.f32 %v873_v20, 0.0  ;;  %v921_v31 = vmax.f32 %v889_v21, 0.0  ;;  %v1362_v34 = vpack.c.bf16 %v907_v25, %v906_v22  ;;  %v839_v36 = vmul.f32 %v1489_v32, %v1999_v24  ;;  %v556_v38 = vpop.f32.mrb[9].mxu0  ;;  %v620_v39 = vpop.f32.mrb[9].mxu1 }
 0x160   : > { %v1402_v35 = vpack.c.bf16 %v923_v27, %v922_v23  ;;  %v855_v37 = vmul.f32 %v1505_v33, %v1999_v24  ;;  %v837_v42 = vmul.f32 %v1999_v24, %v556_v38  ;;  %v853_v43 = vmul.f32 %v1999_v24, %v620_v39  ;;  %v1490_v44 = vpop.f32.mrb[10].mxu0  ;;  %v1506_v45 = vpop.f32.mrb[10].mxu1 }
 0x161   : > { %v1357_v40 = vpack.c.bf16 %v905_v30, %v904_v28  ;;  %v1397_v41 = vpack.c.bf16 %v921_v31, %v920_v29  ;;  %1426 = vst [vmem:[%s2028_s21 + $0x18] sm:$0xff] %v1362_v34   ;;  %v878_v46 = vadd.f32 %v2004_v26, %v839_v36  ;;  %v840_v48 = vmul.f32 %v1490_v44, %v1999_v24  ;;  %v559_v50 = vpop.f32.mrb[11].mxu0  ;;  %v623_v51 = vpop.f32.mrb[11].mxu1 }
 0x162   : > { %1434 = vst [vmem:[%s2028_s21 + $0x58] sm:$0xff] %v1402_v35   ;;  %v894_v47 = vadd.f32 %v2004_v26, %v855_v37  ;;  %v856_v49 = vmul.f32 %v1506_v45, %v1999_v24  ;;  %v876_v52 = vadd.f32 %v2004_v26, %v837_v42  ;;  %v892_v53 = vadd.f32 %v2004_v26, %v853_v43 }
 0x163   : > { %1425 = vst [vmem:[%s2028_s21 + $0x10] sm:$0xff] %v1357_v40   ;;  %1433 = vst [vmem:[%s2028_s21 + $0x50] sm:$0xff] %v1397_v41   ;;  %v838_v54 = vmul.f32 %v1999_v24, %v559_v50  ;;  %v854_v55 = vmul.f32 %v1999_v24, %v623_v51  ;;  %v879_v56 = vadd.f32 %v2004_v26, %v840_v48  ;;  %v910_v60 = vmax.f32 %v878_v46, 0.0 }
 0x164   : > { %v895_v57 = vadd.f32 %v2004_v26, %v856_v49  ;;  %v926_v61 = vmax.f32 %v894_v47, 0.0  ;;  %v908_v0 = vmax.f32 %v876_v52, 0.0  ;;  %v924_v1 = vmax.f32 %v892_v53, 0.0 }
 0x165   : > { %v877_v58 = vadd.f32 %v2004_v26, %v838_v54  ;;  %v893_v59 = vadd.f32 %v2004_v26, %v854_v55  ;;  %v911_v62 = vmax.f32 %v879_v56, 0.0 }
 0x166   : > { %v927_v63 = vmax.f32 %v895_v57, 0.0  ;;  %v1493_v4 = vpop.f32.mrb[12].mxu0  ;;  %v1509_v5 = vpop.f32.mrb[12].mxu1 }
 0x167   : > { %v909_v2 = vmax.f32 %v877_v58, 0.0  ;;  %v925_v3 = vmax.f32 %v893_v59, 0.0  ;;  %v1372_v6 = vpack.c.bf16 %v911_v62, %v910_v60  ;;  %v843_v8 = vmul.f32 %v1493_v4, %v1999_v24  ;;  %v572_v10 = vpop.f32.mrb[13].mxu0  ;;  %v636_v11 = vpop.f32.mrb[13].mxu1 }
 0x168   : > { %v1412_v7 = vpack.c.bf16 %v927_v63, %v926_v61  ;;  %v859_v9 = vmul.f32 %v1509_v5, %v1999_v24  ;;  %v841_v14 = vmul.f32 %v1999_v24, %v572_v10  ;;  %v857_v15 = vmul.f32 %v1999_v24, %v636_v11  ;;  %v1494_v16 = vpop.f32.mrb[14].mxu0  ;;  %v1510_v17 = vpop.f32.mrb[14].mxu1 }
 0x169   : > { %v1367_v12 = vpack.c.bf16 %v909_v2, %v908_v0  ;;  %v1407_v13 = vpack.c.bf16 %v925_v3, %v924_v1  ;;  %1428 = vst [vmem:[%s2028_s21 + $0x28] sm:$0xff] %v1372_v6   ;;  %v882_v18 = vadd.f32 %v2004_v26, %v843_v8  ;;  %v844_v20 = vmul.f32 %v1494_v16, %v1999_v24  ;;  %v575_v22 = vpop.f32.mrb[15].mxu0  ;;  %v639_v23 = vpop.f32.mrb[15].mxu1 }
 0x16a   : > { %1436 = vst [vmem:[%s2028_s21 + $0x68] sm:$0xff] %v1412_v7   ;;  %v898_v19 = vadd.f32 %v2004_v26, %v859_v9  ;;  %v860_v21 = vmul.f32 %v1510_v17, %v1999_v24  ;;  %v880_v25 = vadd.f32 %v2004_v26, %v841_v14  ;;  %v896_v27 = vadd.f32 %v2004_v26, %v857_v15 }
 0x16b   : > { %1427 = vst [vmem:[%s2028_s21 + $0x20] sm:$0xff] %v1367_v12   ;;  %1435 = vst [vmem:[%s2028_s21 + $0x60] sm:$0xff] %v1407_v13   ;;  %v842_v28 = vmul.f32 %v1999_v24, %v575_v22  ;;  %v858_v29 = vmul.f32 %v1999_v24, %v639_v23  ;;  %v883_v30 = vadd.f32 %v2004_v26, %v844_v20  ;;  %v914_v34 = vmax.f32 %v882_v18, 0.0 }
 0x16c   : > { %v899_v31 = vadd.f32 %v2004_v26, %v860_v21  ;;  %v930_v35 = vmax.f32 %v898_v19, 0.0  ;;  %v912_v24 = vmax.f32 %v880_v25, 0.0  ;;  %v928_v38 = vmax.f32 %v896_v27, 0.0 }
 0x16d   : > { %v881_v32 = vadd.f32 %v2004_v26, %v842_v28  ;;  %v897_v33 = vadd.f32 %v2004_v26, %v858_v29  ;;  %v915_v36 = vmax.f32 %v883_v30, 0.0 }
 0x16e   : > { %v931_v37 = vmax.f32 %v899_v31, 0.0 }
 0x16f   : > { %v913_v39 = vmax.f32 %v881_v32, 0.0  ;;  %v929_v40 = vmax.f32 %v897_v33, 0.0  ;;  %v1382_v41 = vpack.c.bf16 %v915_v36, %v914_v34 }
 0x170   : > { %v1422_v42 = vpack.c.bf16 %v931_v37, %v930_v35 }
 0x171   : > { %v1377_v26 = vpack.c.bf16 %v913_v39, %v912_v24  ;;  %v1417_v43 = vpack.c.bf16 %v929_v40, %v928_v38  ;;  %1430 = vst [vmem:[%s2028_s21 + $0x38] sm:$0xff] %v1382_v41  }
 0x172   : > { %1438 = vst [vmem:[%s2028_s21 + $0x78] sm:$0xff] %v1422_v42  }
 0x173   : > { %1429 = vst [vmem:[%s2028_s21 + $0x30] sm:$0xff] %v1377_v26   ;;  %1437 = vst [vmem:[%s2028_s21 + $0x70] sm:$0xff] %v1417_v43  }
 0x174   : > { %1699 = shalt.err (!%p1696_p5)
}
 0x175   : > { %s1700_s8 = scalar_lea.hbm %s2091_s18, 2048  ;;  %s1704_s27 = scalar_lea.hbm %s2150_s4, 4096 }
 0x176   : > { %p1701_p9 = scmp.ne.s32.totalorder %s2091_s18, %s1700_s8  ;;  %p1705_p3 = scmp.lt.u32.totalorder %s2091_s18, %s2150_s4 }
 0x177   : > { %p1706_p7 = scmp.lt.u32.totalorder %s1704_s27, %s1700_s8  ;;  %p1708_p4 = scmp.lt.u32.totalorder %s1700_s8, %s2091_s18 }
 0x178   : > { %p1702_p1 = pnand %p1701_p9, %p1905_p10 }
 0x179   : > { %p1707_p13 = por %p1706_p7, %p1705_p3 }
 0x17a   : > { %p1703_p2 = pneg %p1702_p1 }
 0x17b   : > { %p1709_p6 = por %p1708_p4, %p1707_p13 }
 0x17d   : > { %p1710_p8 = pnand %p1709_p6, %p1703_p2 }
 0x17f   : > { %1713 = shalt.err (!%p1710_p8)
}
 0x180   : > { %s1779_s22 = smov 64   ;;  %s1780_s6 = smov 4  }
 0x181   : > { %1533 = dma.vmem_to_hbm [thread:$0]  (%p1905_p10), %s2093_s28, 2048, %s2091_s18, %s1093_s9, %s1779_s22, %s1779_s22, %s1780_s6  }
 0x182 PF: > { %s1122_s29 = sand.u32 1, %s1752_s15   ;;  %p2168_p12 = scmp.ne.s32.totalorder %s2158_s26, 0 }
 0x183   : > { %p2169_p11 = scmp.ge.s32.totalorder %s1772_s20, 2  ;;  %s1123_s11 = scalar_lea.sflag [#allocation5], %s1122_s29 }
 0x185   : > { %p1544_p0 = pnand %p2169_p11, %p2168_p12 }
 0x187   : > { %1747 = dma.done.wait (!%p1544_p0), %s1123_s11, 2048  }
 0x188   : > { %1749 = vsyncadd (!%p1544_p0), %s1123_s11, 4294965248  ;;  %s21_s20 = sadd.s32 1, %s1772_s20   ;;  %s2170_s15 = smov %s1756_s16 }
 0x189   : > { %p18_p5 = scmp.ge.s32.totalorder %s21_s20, 4   ;;  %s2171_s16 = smov %s1760_s17 }
 0x18a   : > { %s2172_s17 = smov %s1914_s10  ;;  %s2173_s18 = smov %s1768_s19 }
 0x18b   : > { %s2174_s19 = smov %s2176_s5  ;;  %20 = sbr.rel (!%p18_p5) target bundleno = 7 (0x7), region = 104 }
 0x192   :  { %1128 = vsyncpa [#allocation4], 1 }
 0x193   :  { %1130 = vsyncpa [#allocation4 + $0x1], 1 }
 0x194   :  { %1131 = vsyncpa [#allocation7], 1 }
 0x195   :  { %1132 = vsyncpa [#allocation5], 1 }
 0x196   :  { %1134 = vsyncpa [#allocation5 + $0x1], 1 }

</bundles_post_ra>
